<compile_context>
chip_gen: v7x
topology: tpu7x:2x2x1
jax: 0.10.0
libtpu: 0.0.40
codegen_flags: <defaults>
</compile_context>

<pallas_src>
import functools

import jax
import jax.numpy as jnp
from jax.experimental import pallas as pl
from jax.experimental.pallas import tpu as pltpu


# ----------------------------------------------------------------------------- kernel

def fused_ginnet_kernel(x_ref, a_ref, ew_ref, eb_ref, w1_ref, w2_ref, vecs_ref,
                        o_ref, *, eps, residual, n_layers):
    """Whole network in one invocation.  All operands are VMEM-resident.

    w1_ref / w2_ref : (L, D, D) f32, BN1 / BN_A scales pre-folded into columns.
    vecs_ref        : (L, 4, D) f32 rows = [c1, c2, bnN_scale, bnN_shift]
                      (c1 = b1*s1 + t1, c2 = b2*sA + tA, folded on the host).
    """
    # Embedding: h = x @ We + be   (f32, runs once, straight-line)
    h = (jnp.dot(x_ref[...], ew_ref[...], preferred_element_type=jnp.float32)
         + eb_ref[...])                                        # (N, D) f32

    a = a_ref[...]                                             # (N, N) bf16 (0/1 exact)

    # Statically unrolled layer loop -> entire net visible to the scheduler.
    for l in range(n_layers):
        # Neighbor sum aggregation on the native bf16 MXU path, f32 accumulation.
        # (h is rounded to bf16 only for this product.)
        neigh = jnp.dot(a, h.astype(jnp.bfloat16),
                        preferred_element_type=jnp.float32)    # (N, D) f32

        if eps == 0.0:                                         # compile-time constant
            u = h + neigh
        else:
            u = (1.0 + eps) * h + neigh

        V = vecs_ref[l]                                        # (4, D)

        # MLP hidden layer: Linear1 (+ folded BN1) -> ReLU
        z = jnp.maximum(
            jnp.dot(u, w1_ref[l], preferred_element_type=jnp.float32) + V[0:1, :],
            0.0)
        # MLP output layer: Linear2 (+ folded ApplyNodeFunc BN_A) -> ReLU
        z = jnp.maximum(
            jnp.dot(z, w2_ref[l], preferred_element_type=jnp.float32) + V[1:2, :],
            0.0)
        # GINLayer bn_node_h (eval) -> ReLU -> residual -> dropout(eval == identity)
        z = jnp.maximum(z * V[2:3, :] + V[3:4, :], 0.0)
        h = h + z if residual else z

    o_ref[...] = h                                             # single HBM writeback


# ----------------------------------------------------------------------------- wrapper

def ginnet_forward(x, A, emb_w, emb_b, w1f, w2f, vecs, *, eps=0.0, residual=True):
    """Single un-gridded pallas_call; everything resident in VMEM."""
    N, Fin = x.shape
    D = emb_w.shape[1]
    L = w1f.shape[0]

    # 0/1 adjacency is exact in bf16 and feeds the bf16 MXU path directly.
    # TODO(synk): if the adjacency ever carries edge weights / normalization,
    # keep it f32 (bf16 would silently truncate).
    a_bf16 = A.astype(jnp.bfloat16)

    flops = 2 * N * Fin * D + L * (2 * N * N * D + 2 * (2 * N * D * D))
    bytes_accessed = (N * Fin * 4 + N * N * 2 + Fin * D * 4 + D * 4
                      + 2 * L * D * D * 4 + L * 4 * D * 4 + N * D * 4)

    vmem_spec = pl.BlockSpec(memory_space=pltpu.MemorySpace.VMEM)  # full array, resident
    kernel = functools.partial(fused_ginnet_kernel, eps=eps, residual=residual,
                               n_layers=L)
    return pl.pallas_call(
        kernel,
        out_shape=jax.ShapeDtypeStruct((N, D), jnp.float32),
        in_specs=[vmem_spec] * 7,
        out_specs=vmem_spec,
        cost_estimate=pl.CostEstimate(flops=flops, transcendentals=0,
                                      bytes_accessed=bytes_accessed),
        compiler_params=pltpu.CompilerParams(vmem_limit_bytes=8 * 1024 * 1024),
    )(x.astype(jnp.float32), a_bf16, emb_w, emb_b, w1f, w2f, vecs)


# ----------------------------------------------------------------------------- params

def bn_fold(gamma, beta, mean, var, eps=1e-5):
    scale = gamma / jnp.sqrt(var + eps)
    shift = beta - mean * scale
    return scale, shift


def init_params(key, in_dim, hidden_dim, n_layers):
    """Deterministic synthetic raw parameters (eval-mode BN with non-trivial stats)."""
    D = hidden_dim
    keys = jax.random.split(key, 2 + 2 * n_layers)
    emb_w = 0.1 * jax.random.normal(keys[0], (in_dim, D), jnp.float32)
    emb_b = 0.1 * jax.random.normal(keys[1], (1, D), jnp.float32)

    idx = jnp.arange(D, dtype=jnp.float32)

    def bn_params(off):
        gamma = 1.0 + 0.1 * jnp.sin(idx + off)
        beta = 0.05 * jnp.cos(idx + off)
        mean = 0.02 * jnp.sin(0.5 * idx + off)
        var = 1.0 + 0.1 * jnp.cos(0.3 * idx + off) ** 2
        return jnp.stack([gamma, beta, mean, var], axis=0)          # (4, D)

    w1s, w2s, b1s, b2s, bn1s, bnAs, bnNs = [], [], [], [], [], [], []
    for l in range(n_layers):
        w1s.append(0.1 * jax.random.normal(keys[2 + 2 * l], (D, D), jnp.float32))
        w2s.append(0.1 * jax.random.normal(keys[3 + 2 * l], (D, D), jnp.float32))
        b1s.append(0.05 * jnp.sin(idx + l))
        b2s.append(0.05 * jnp.cos(idx + l))
        bn1s.append(bn_params(l + 0.1))
        bnAs.append(bn_params(l + 0.2))
        bnNs.append(bn_params(l + 0.3))

    return dict(emb_w=emb_w, emb_b=emb_b,
                w1=jnp.stack(w1s), w2=jnp.stack(w2s),
                b1=jnp.stack(b1s), b2=jnp.stack(b2s),
                bn1=jnp.stack(bn1s), bnA=jnp.stack(bnAs), bnN=jnp.stack(bnNs))


def fold_params(p):
    """Host-side folding of eval-mode BN1 / BN_A into W1 / W2 and combined biases."""
    s1, t1 = bn_fold(p["bn1"][:, 0], p["bn1"][:, 1], p["bn1"][:, 2], p["bn1"][:, 3])
    sA, tA = bn_fold(p["bnA"][:, 0], p["bnA"][:, 1], p["bnA"][:, 2], p["bnA"][:, 3])
    sN, tN = bn_fold(p["bnN"][:, 0], p["bnN"][:, 1], p["bnN"][:, 2], p["bnN"][:, 3])
    w1f = p["w1"] * s1[:, None, :]                 # scale output columns
    c1 = p["b1"] * s1 + t1
    w2f = p["w2"] * sA[:, None, :]
    c2 = p["b2"] * sA + tA
    vecs = jnp.stack([c1, c2, sN, tN], axis=1)     # (L, 4, D)
    return w1f, w2f, vecs


# ----------------------------------------------------------------------------- reference

def ginnet_reference(x, A, p, *, eps=0.0, residual=True):
    """Pure-JAX reference mirroring the PyTorch eval-mode forward (unfolded BN)."""
    hp = jax.lax.Precision.HIGHEST

    def bn_eval(z, bn):
        g, b, m, v = bn
        return (z - m) / jnp.sqrt(v + 1e-5) * g + b

    h = jnp.dot(x.astype(jnp.float32), p["emb_w"], precision=hp) + p["emb_b"]
    for l in range(p["w1"].shape[0]):
        neigh = jnp.dot(A, h, precision=hp)
        u = (1.0 + eps) * h + neigh
        z = jnp.dot(u, p["w1"][l], precision=hp) + p["b1"][l]
        z = jnp.maximum(bn_eval(z, p["bn1"][l]), 0.0)
        z = jnp.dot(z, p["w2"][l], precision=hp) + p["b2"][l]
        z = jnp.maximum(bn_eval(z, p["bnA"][l]), 0.0)
        z = jnp.maximum(bn_eval(z, p["bnN"][l]), 0.0)
        h = h + z if residual else z
    return h


# ----------------------------------------------------------------------------- main

if __name__ == "__main__":
    # net_params: in_dim=16, hidden_dim=32, L=2, n_mlp_GIN=2, learn_eps=False,
    # neighbor_aggr='sum', batch_norm=True, residual=True, dropout=0 (eval), pos_enc=False
    N, IN_DIM, HIDDEN, L = 64, 16, 32, 2
    EPS = 0.0

    key = jax.random.PRNGKey(0)
    k_x, k_a, k_p = jax.random.split(key, 3)

    x = jax.random.normal(k_x, (N, IN_DIM), jnp.float32)
    # dense adjacency: A[i, j] = 1 iff edge j -> i
    A = (jax.random.uniform(k_a, (N, N)) < 0.1).astype(jnp.float32)

    params = init_params(k_p, IN_DIM, HIDDEN, L)
    w1f, w2f, vecs = fold_params(params)

    out = ginnet_forward(x, A, params["emb_w"], params["emb_b"], w1f, w2f, vecs,
                         eps=EPS, residual=True)
    out = jax.block_until_ready(out)

    ref = ginnet_reference(x, A, params, eps=EPS, residual=True)
    assert out.shape == (N, HIDDEN)
    # Tolerance accounts for the bf16-operand aggregation matmul (h rounded to
    # bf16 for A @ h only; ~1e-3 relative per layer, f32 accumulation).
    assert jnp.allclose(out, ref, atol=1e-2, rtol=1e-2), "mismatch vs JAX reference"

    # TODO(synk): readout pooling / linears_prediction are only used in
    # inference()/loss(), not in forward(), so they are not part of this kernel.
    print("KERNEL_OK")
</pallas_src>

<mosaic_0001>
module attributes {stable_mosaic.version = 11 : i64} {
  func.func @fused_ginnet_kernel(%arg0: memref<64x16xf32, #tpu.memory_space<vmem>>, %arg1: memref<64x64xbf16, #tpu.memory_space<vmem>>, %arg2: memref<16x32xf32, #tpu.memory_space<vmem>>, %arg3: memref<1x32xf32, #tpu.memory_space<vmem>>, %arg4: memref<2x32x32xf32, #tpu.memory_space<vmem>>, %arg5: memref<2x32x32xf32, #tpu.memory_space<vmem>>, %arg6: memref<2x4x32xf32, #tpu.memory_space<vmem>>, %arg7: memref<64x32xf32, #tpu.memory_space<vmem>>) attributes {dimension_semantics = [], scalar_prefetch = 0 : i64, scratch_operands = 0 : i64, tpu.core_type = #tpu.core_type<tc>} {
    %c0 = arith.constant 0 : index
    %c0_0 = arith.constant 0 : index
    %0 = vector.load %arg0[%c0, %c0_0] : memref<64x16xf32, #tpu.memory_space<vmem>>, vector<64x16xf32>
    %c0_1 = arith.constant 0 : index
    %c0_2 = arith.constant 0 : index
    %1 = vector.load %arg2[%c0_1, %c0_2] : memref<16x32xf32, #tpu.memory_space<vmem>>, vector<16x32xf32>
    %cst = arith.constant dense<0.000000e+00> : vector<64x32xf32>
    %2 = tpu.matmul %0, %1, %cst {dimension_numbers = #tpu.dot_dimension_numbers<[1], [0], [0], [1], [0, 0, 1, 1], [], []>} : vector<64x16xf32>, vector<16x32xf32>, vector<64x32xf32> -> vector<64x32xf32>
    %c0_3 = arith.constant 0 : index
    %c0_4 = arith.constant 0 : index
    %3 = vector.load %arg3[%c0_3, %c0_4] : memref<1x32xf32, #tpu.memory_space<vmem>>, vector<1x32xf32>
    %4 = vector.broadcast %3 : vector<1x32xf32> to vector<64x32xf32>
    %5 = arith.addf %2, %4 : vector<64x32xf32>
    %c0_5 = arith.constant 0 : index
    %c0_6 = arith.constant 0 : index
    %6 = vector.load %arg1[%c0_5, %c0_6] : memref<64x64xbf16, #tpu.memory_space<vmem>>, vector<64x64xbf16>
    %7 = arith.truncf %5 : vector<64x32xf32> to vector<64x32xbf16>
    %cst_7 = arith.constant dense<0.000000e+00> : vector<64x32xf32>
    %8 = tpu.matmul %6, %7, %cst_7 {dimension_numbers = #tpu.dot_dimension_numbers<[1], [0], [0], [1], [0, 0, 1, 1], [], []>} : vector<64x64xbf16>, vector<64x32xbf16>, vector<64x32xf32> -> vector<64x32xf32>
    %9 = arith.addf %5, %8 : vector<64x32xf32>
    %c0_8 = arith.constant 0 : index
    %c0_9 = arith.constant 0 : index
    %c0_10 = arith.constant 0 : index
    %10 = vector.load %arg6[%c0_8, %c0_9, %c0_10] : memref<2x4x32xf32, #tpu.memory_space<vmem>>, vector<1x4x32xf32>
    %11 = vector.shape_cast %10 : vector<1x4x32xf32> to vector<4x32xf32>
    %c0_11 = arith.constant 0 : index
    %c0_12 = arith.constant 0 : index
    %c0_13 = arith.constant 0 : index
    %12 = vector.load %arg4[%c0_11, %c0_12, %c0_13] : memref<2x32x32xf32, #tpu.memory_space<vmem>>, vector<1x32x32xf32>
    %13 = vector.shape_cast %12 : vector<1x32x32xf32> to vector<32x32xf32>
    %cst_14 = arith.constant dense<0.000000e+00> : vector<64x32xf32>
    %14 = tpu.matmul %9, %13, %cst_14 {dimension_numbers = #tpu.dot_dimension_numbers<[1], [0], [0], [1], [0, 0, 1, 1], [], []>} : vector<64x32xf32>, vector<32x32xf32>, vector<64x32xf32> -> vector<64x32xf32>
    %15 = vector.extract_strided_slice %11 {offsets = [0, 0], sizes = [1, 32], strides = [1, 1]} : vector<4x32xf32> to vector<1x32xf32>
    %16 = vector.broadcast %15 : vector<1x32xf32> to vector<64x32xf32>
    %17 = arith.addf %14, %16 : vector<64x32xf32>
    %cst_15 = arith.constant 0.000000e+00 : f32
    %18 = vector.broadcast %cst_15 : f32 to vector<64x32xf32>
    %19 = arith.maximumf %17, %18 : vector<64x32xf32>
    %c0_16 = arith.constant 0 : index
    %c0_17 = arith.constant 0 : index
    %c0_18 = arith.constant 0 : index
    %20 = vector.load %arg5[%c0_16, %c0_17, %c0_18] : memref<2x32x32xf32, #tpu.memory_space<vmem>>, vector<1x32x32xf32>
    %21 = vector.shape_cast %20 : vector<1x32x32xf32> to vector<32x32xf32>
    %cst_19 = arith.constant dense<0.000000e+00> : vector<64x32xf32>
    %22 = tpu.matmul %19, %21, %cst_19 {dimension_numbers = #tpu.dot_dimension_numbers<[1], [0], [0], [1], [0, 0, 1, 1], [], []>} : vector<64x32xf32>, vector<32x32xf32>, vector<64x32xf32> -> vector<64x32xf32>
    %23 = vector.extract_strided_slice %11 {offsets = [1, 0], sizes = [1, 32], strides = [1, 1]} : vector<4x32xf32> to vector<1x32xf32>
    %24 = vector.broadcast %23 : vector<1x32xf32> to vector<64x32xf32>
    %25 = arith.addf %22, %24 : vector<64x32xf32>
    %cst_20 = arith.constant 0.000000e+00 : f32
    %26 = vector.broadcast %cst_20 : f32 to vector<64x32xf32>
    %27 = arith.maximumf %25, %26 : vector<64x32xf32>
    %28 = vector.extract_strided_slice %11 {offsets = [2, 0], sizes = [1, 32], strides = [1, 1]} : vector<4x32xf32> to vector<1x32xf32>
    %29 = vector.broadcast %28 : vector<1x32xf32> to vector<64x32xf32>
    %30 = arith.mulf %27, %29 : vector<64x32xf32>
    %31 = vector.extract_strided_slice %11 {offsets = [3, 0], sizes = [1, 32], strides = [1, 1]} : vector<4x32xf32> to vector<1x32xf32>
    %32 = vector.broadcast %31 : vector<1x32xf32> to vector<64x32xf32>
    %33 = arith.addf %30, %32 : vector<64x32xf32>
    %cst_21 = arith.constant 0.000000e+00 : f32
    %34 = vector.broadcast %cst_21 : f32 to vector<64x32xf32>
    %35 = arith.maximumf %33, %34 : vector<64x32xf32>
    %36 = arith.addf %5, %35 : vector<64x32xf32>
    %37 = arith.truncf %36 : vector<64x32xf32> to vector<64x32xbf16>
    %cst_22 = arith.constant dense<0.000000e+00> : vector<64x32xf32>
    %38 = tpu.matmul %6, %37, %cst_22 {dimension_numbers = #tpu.dot_dimension_numbers<[1], [0], [0], [1], [0, 0, 1, 1], [], []>} : vector<64x64xbf16>, vector<64x32xbf16>, vector<64x32xf32> -> vector<64x32xf32>
    %39 = arith.addf %36, %38 : vector<64x32xf32>
    %c1 = arith.constant 1 : index
    %c0_23 = arith.constant 0 : index
    %c0_24 = arith.constant 0 : index
    %40 = vector.load %arg6[%c1, %c0_23, %c0_24] : memref<2x4x32xf32, #tpu.memory_space<vmem>>, vector<1x4x32xf32>
    %41 = vector.shape_cast %40 : vector<1x4x32xf32> to vector<4x32xf32>
    %c1_25 = arith.constant 1 : index
    %c0_26 = arith.constant 0 : index
    %c0_27 = arith.constant 0 : index
    %42 = vector.load %arg4[%c1_25, %c0_26, %c0_27] : memref<2x32x32xf32, #tpu.memory_space<vmem>>, vector<1x32x32xf32>
    %43 = vector.shape_cast %42 : vector<1x32x32xf32> to vector<32x32xf32>
    %cst_28 = arith.constant dense<0.000000e+00> : vector<64x32xf32>
    %44 = tpu.matmul %39, %43, %cst_28 {dimension_numbers = #tpu.dot_dimension_numbers<[1], [0], [0], [1], [0, 0, 1, 1], [], []>} : vector<64x32xf32>, vector<32x32xf32>, vector<64x32xf32> -> vector<64x32xf32>
    %45 = vector.extract_strided_slice %41 {offsets = [0, 0], sizes = [1, 32], strides = [1, 1]} : vector<4x32xf32> to vector<1x32xf32>
    %46 = vector.broadcast %45 : vector<1x32xf32> to vector<64x32xf32>
    %47 = arith.addf %44, %46 : vector<64x32xf32>
    %cst_29 = arith.constant 0.000000e+00 : f32
    %48 = vector.broadcast %cst_29 : f32 to vector<64x32xf32>
    %49 = arith.maximumf %47, %48 : vector<64x32xf32>
    %c1_30 = arith.constant 1 : index
    %c0_31 = arith.constant 0 : index
    %c0_32 = arith.constant 0 : index
    %50 = vector.load %arg5[%c1_30, %c0_31, %c0_32] : memref<2x32x32xf32, #tpu.memory_space<vmem>>, vector<1x32x32xf32>
    %51 = vector.shape_cast %50 : vector<1x32x32xf32> to vector<32x32xf32>
    %cst_33 = arith.constant dense<0.000000e+00> : vector<64x32xf32>
    %52 = tpu.matmul %49, %51, %cst_33 {dimension_numbers = #tpu.dot_dimension_numbers<[1], [0], [0], [1], [0, 0, 1, 1], [], []>} : vector<64x32xf32>, vector<32x32xf32>, vector<64x32xf32> -> vector<64x32xf32>
    %53 = vector.extract_strided_slice %41 {offsets = [1, 0], sizes = [1, 32], strides = [1, 1]} : vector<4x32xf32> to vector<1x32xf32>
    %54 = vector.broadcast %53 : vector<1x32xf32> to vector<64x32xf32>
    %55 = arith.addf %52, %54 : vector<64x32xf32>
    %cst_34 = arith.constant 0.000000e+00 : f32
    %56 = vector.broadcast %cst_34 : f32 to vector<64x32xf32>
    %57 = arith.maximumf %55, %56 : vector<64x32xf32>
    %58 = vector.extract_strided_slice %41 {offsets = [2, 0], sizes = [1, 32], strides = [1, 1]} : vector<4x32xf32> to vector<1x32xf32>
    %59 = vector.broadcast %58 : vector<1x32xf32> to vector<64x32xf32>
    %60 = arith.mulf %57, %59 : vector<64x32xf32>
    %61 = vector.extract_strided_slice %41 {offsets = [3, 0], sizes = [1, 32], strides = [1, 1]} : vector<4x32xf32> to vector<1x32xf32>
    %62 = vector.broadcast %61 : vector<1x32xf32> to vector<64x32xf32>
    %63 = arith.addf %60, %62 : vector<64x32xf32>
    %cst_35 = arith.constant 0.000000e+00 : f32
    %64 = vector.broadcast %cst_35 : f32 to vector<64x32xf32>
    %65 = arith.maximumf %63, %64 : vector<64x32xf32>
    %66 = arith.addf %36, %65 : vector<64x32xf32>
    %c0_36 = arith.constant 0 : index
    %c0_37 = arith.constant 0 : index
    %67 = vector.load %arg7[%c0_36, %c0_37] : memref<64x32xf32, #tpu.memory_space<vmem>>, vector<64x32xf32>
    tpu.vector_store %arg7[%c0_36, %c0_37], %66 {strides = array<i32>} : memref<64x32xf32, #tpu.memory_space<vmem>>, vector<64x32xf32>,
    return
  }
}

</mosaic_0001>

<bundles_post_ra>
// kernel: tpu_custom_call.1
= control target key start
LH: loop header
LB: loop body
LE: loop exit
PB: predicated region body
PF: predicated region fallthrough
CT: control target
= control target key end

     0   :  { %12 = vsyncpa [#allocation3], 0  ;;  %s1762_s0 = inlined_call_operand.vmem [shape: f32[64,16], index: 0, kind: input, shape index: {}]   ;;  %s1763_s1 = inlined_call_operand.hbm [shape: bf16[64,64], index: 1, kind: input, shape index: {}]   ;;  %s1764_s2 = inlined_call_operand.vmem [shape: f32[16,32], index: 2, kind: input, shape index: {}]   ;;  %s1765_s3 = inlined_call_operand.vmem [shape: f32[1,32], index: 3, kind: input, shape index: {}]   ;;  %s1766_s4 = inlined_call_operand.vmem [shape: f32[2,32,32], index: 4, kind: input, shape index: {}]   ;;  %s1767_s5 = inlined_call_operand.hbm [shape: f32[2,32,32], index: 5, kind: input, shape index: {}]   ;;  %s1768_s6 = inlined_call_operand.vmem [shape: f32[2,4,32], index: 6, kind: input, shape index: {}]   ;;  %s1769_s7 = inlined_call_operand.vmem [shape: f32[64,32], index: 7, kind: output, shape index: {}]  }
   0x1   :  { %13 = vsyncpa [#allocation5], 0  ;;  %s1431_s24 = smov [#allocation2]   ;;  %s1383_s28 = scalar_lea.hbm %s1763_s1, 512 }
   0x2   :  { %s21_s25 = sshll.u32 %s1431_s24, 4  ;;  %p1384_p0 = scmp.ne.s32.totalorder %s1763_s1, %s1383_s28  ;;  %s22_s25 = int_to_ptr.vmem [resolvable:$true] %s21_s25 }
   0x3   :  { %p1387_p1 = scmp.lt.u32.totalorder %s1383_s28, %s1763_s1 }
   0x5   :  { %p1389_p2 = pnand %p1387_p1, %p1384_p0 }
   0x7   :  { %1392 = shalt.err (!%p1389_p2)
}
   0x8   :  { %s1393_s10 = scalar_lea.vmem %s22_s25, 512  ;;  %p1398_p4 = scmp.lt.s32.totalorder %s22_s25, %s22_s25 }
   0x9   :  { %p1394_p3 = scmp.ne.s32.totalorder %s22_s25, %s1393_s10  ;;  %p1399_p5 = scmp.lt.s32.totalorder %s1393_s10, %s1393_s10 }
   0xb   :  { %p1400_p6 = por %p1399_p5, %p1398_p4 }
   0xd   :  { %p1401_p7 = pnand %p1400_p6, %p1394_p3 }
   0xf   :  { %1404 = shalt.err (!%p1401_p7)
}
  0x10   :  { %s1432_s11 = smov 64   ;;  %s1433_s12 = smov 4  }
  0x11   :  { %27 = dma.hbm_to_vmem [thread:$0]  %s1763_s1, 512, %s22_s25, [#allocation3], %s1432_s11, %s1432_s11, %s1433_s12  }
  0x12   :  { %s1434_s15 = smov [#allocation4]   ;;  %s1405_s19 = scalar_lea.hbm %s1767_s5, 1024 }
  0x13   :  { %s39_s16 = sshll.u32 %s1434_s15, 4  ;;  %p1406_p8 = scmp.ne.s32.totalorder %s1767_s5, %s1405_s19  ;;  %s40_s16 = int_to_ptr.vmem [resolvable:$true] %s39_s16 }
  0x14   :  { %p1409_p9 = scmp.lt.u32.totalorder %s1405_s19, %s1767_s5 }
  0x16   :  { %p1411_p10 = pnand %p1409_p9, %p1406_p8 }
  0x18   :  { %1414 = shalt.err (!%p1411_p10)
}
  0x19   :  { %s1415_s24 = scalar_lea.vmem %s40_s16, 1024  ;;  %p1420_p12 = scmp.lt.s32.totalorder %s40_s16, %s40_s16 }
  0x1a   :  { %p1416_p11 = scmp.ne.s32.totalorder %s40_s16, %s1415_s24  ;;  %p1421_p13 = scmp.lt.s32.totalorder %s1415_s24, %s1415_s24 }
  0x1c   :  { %p1422_p0 = por %p1421_p13, %p1420_p12 }
  0x1e   :  { %p1423_p1 = pnand %p1422_p0, %p1416_p11 }
  0x20   :  { %1426 = shalt.err (!%p1423_p1)
}
  0x21   :  { %s1435_s1 = smov 128   ;;  %s1436_s25 = smov 8  }
  0x22   :  { %45 = dma.hbm_to_vmem [thread:$0]  %s1767_s5, 1024, %s40_s16, [#allocation5], %s1435_s1, %s1435_s1, %s1436_s25  }
  0x23   :  { %1427 = dma.done.wait [#allocation3], 512  }
  0x24   :  { %1428 = vsyncadd [#allocation3], 4294966784 }
  0x25   :  { %1429 = dma.done.wait [#allocation5], 1024  }
  0x26   :  { %1430 = vsyncadd [#allocation5], 4294966272  ;;  %vm72_vm0 = vcmask 130048   ;;  %v63_v0 = vld [vmem:[%s1764_s2] sm:$0xff]  ;;  %v64_v1 = vld [vmem:[%s1764_s2 + $0x8] sm:$0xff]  ;;  %vm234_vm1 = vcmask 523264  }
  0x27   :  { %v55_v2 = vld [vmem:[%s1762_s0] sm:$0xff]  ;;  %v1337_v3 = vpack.c.bf16 %v64_v1, %v63_v0  ;;  %v56_v4 = vld [vmem:[%s1762_s0 + $0x8] sm:$0xff]  ;;  %v57_v5 = vld [vmem:[%s1762_s0 + $0x10] sm:$0xff]  ;;  %vm329_vm2 = vcmask 261120   ;;  %v325_v0 = vlaneseq }
  0x28   :  { %1213 = vmatprep.mubr.msk.f32.mxu0 %vm72_vm0, %v55_v2  ;;  %v58_v6 = vld [vmem:[%s1762_s0 + $0x18] sm:$0xff]  ;;  %v59_v7 = vld [vmem:[%s1762_s0 + $0x20] sm:$0xff]  ;;  %v60_v8 = vld [vmem:[%s1762_s0 + $0x28] sm:$0xff] }
  0x29   :  { %1338 = vmatprep.subr.bf16.mxu0 %v1337_v3  ;;  %v61_v9 = vld [vmem:[%s1762_s0 + $0x30] sm:$0xff]  ;;  %v62_v10 = vld [vmem:[%s1762_s0 + $0x38] sm:$0xff]  ;;  %v1539_v11 = vld [vmem:[#allocation2] sm:$0xff]   ;;  %v1612_v1 = vshrl.u32 %v325_v0, 7 }
  0x2a   :  { %1340 = vmatpush3.bf16.msra.mxu0 %v1337_v3  ;;  %1233 = vmatprep.mubr.msk.bf16.mxu1 %vm234_vm1, %v1539_v11  ;;  %v321_v12 = vld [vmem:[%s1766_s4] sm:$0xff]  ;;  %v322_v13 = vld [vmem:[%s1766_s4 + $0x8] sm:$0xff]  ;;  %v323_v14 = vld [vmem:[%s1766_s4 + $0x10] sm:$0xff] }
  0x2b   :  { %v1341_v15 = vpack.c.bf16 %v322_v13, %v321_v12  ;;  %v324_v16 = vld [vmem:[%s1766_s4 + $0x18] sm:$0xff]  ;;  %v1077_v18 = vld [vmem:[%s1765_s3] ss:$0 sm:$0xff]  ;;  %v1582_v39 = vld [vmem:[#allocation2 + $0x8] sm:$0xff]   ;;  %v327_v2 = vsub.s32 0, %v1612_v1 }
  0x2c   :  { %v1345_v17 = vpack.c.bf16 %v324_v16, %v323_v14  ;;  %v1584_v40 = vld [vmem:[#allocation2 + $0x10] sm:$0xff]   ;;  %v1590_v41 = vld [vmem:[#allocation2 + $0x18] sm:$0xff]   ;;  %v467_v42 = vld [vmem:[#allocation4] sm:$0xff] }
  0x2d   :  { %1214 = vmatmul.mubr.msk.f32.vlgmr.msra.gmra.mrb[0].mxu0 %vm72_vm0, %v56_v4  ;;  %1342 = vmatprep.subr.bf16.mxu0 %v1341_v15  ;;  %v468_v43 = vld [vmem:[#allocation4 + $0x8] sm:$0xff]  ;;  %v469_v44 = vld [vmem:[#allocation4 + $0x10] sm:$0xff]  ;;  %v470_v46 = vld [vmem:[#allocation4 + $0x18] sm:$0xff] }
  0x2e   :  { %1216 = vmatprep.mubr.msk.f32.mxu0 %vm72_vm0, %v57_v5  ;;  %1344 = vmatpush3.bf16.msra.mxu0 %v1341_v15  ;;  %v1349_v45 = vpack.c.bf16 %v468_v43, %v467_v42  ;;  %v1353_v47 = vpack.c.bf16 %v470_v46, %v469_v44  ;;  %v320_v3 = vld [vmem:[%s1768_s6] sm:$0xf]  ;;  %v1117_v42 = vld [vmem:[%s1766_s4 + $0x30] sm:$0xff]  ;;  %v1118_v44 = vld [vmem:[%s1766_s4 + $0x38] sm:$0xff]  ;;  %v473_v46 = vsub.s32 1, %v1612_v1 }
  0x2f   :  { %1346 = vmatprep.subr.bf16.mxu0 %v1345_v17  ;;  %v328_v4 = vrot.slane %v320_v3, %v327_v2 }
  0x31   :  { %1217 = vmatmul.mubr.msk.f32.gmra.mrb[2].mxu0 %vm72_vm0, %v58_v6 }
  0x32   :  { %1219 = vmatprep.mubr.msk.f32.mxu0 %vm72_vm0, %v59_v7  ;;  %1348 = vmatpush3.bf16.msra.mxu0 %v1345_v17 }
  0x35   :  { %1220 = vmatmul.mubr.msk.f32.gmra.mrb[4].mxu0 %vm72_vm0, %v60_v8 }
  0x36   :  { %1222 = vmatprep.mubr.msk.f32.mxu0 %vm72_vm0, %v61_v9 }
  0x39   :  { %1223 = vmatmul.mubr.msk.f32.gmra.mrb[6].mxu0 %vm72_vm0, %v62_v10 }
 0x100   :  { %v1215_v19 = vpop.f32.mrb[0].mxu0 }
 0x101   :  { %v1558_v20 = vadd.f32 %v1215_v19, %v1077_v18  ;;  %v163_v21 = vpop.f32.mrb[1].mxu0 }
 0x102   :  { %v1560_v22 = vadd.f32 %v1077_v18, %v163_v21 }
 0x104   :  { %v1218_v23 = vpop.f32.mrb[2].mxu0  ;;  %v210_v24 = vpack.c.bf16 %v1558_v20, %v1560_v22 }
 0x105   :  { %v1564_v25 = vadd.f32 %v1218_v23, %v1077_v18  ;;  %v173_v26 = vpop.f32.mrb[3].mxu0 }
 0x106   :  { %v1566_v27 = vadd.f32 %v1077_v18, %v173_v26  ;;  %1225 = vmatprep.subr.bf16.mxu1 %v210_v24 }
 0x107   :  { %1226 = vmatpush3.bf16.msra.mxu1 %v210_v24 }
 0x108   :  { %v1221_v28 = vpop.f32.mrb[4].mxu0  ;;  %v211_v29 = vpack.c.bf16 %v1564_v25, %v1566_v27 }
 0x109   :  { %v1570_v30 = vadd.f32 %v1221_v28, %v1077_v18  ;;  %v183_v31 = vpop.f32.mrb[5].mxu0 }
 0x10a   :  { %v1572_v32 = vadd.f32 %v1077_v18, %v183_v31  ;;  %1227 = vmatprep.subr.bf16.mxu1 %v211_v29 }
 0x10b   :  { %1228 = vmatpush3.bf16.msra.mxu1 %v211_v29 }
 0x10c   :  { %v1224_v33 = vpop.f32.mrb[6].mxu0  ;;  %v212_v34 = vpack.c.bf16 %v1570_v30, %v1572_v32 }
 0x10d   :  { %v1576_v35 = vadd.f32 %v1224_v33, %v1077_v18  ;;  %v193_v36 = vpop.f32.mrb[7].mxu0 }
 0x10e   :  { %v1578_v37 = vadd.f32 %v1077_v18, %v193_v36  ;;  %1229 = vmatprep.subr.bf16.mxu1 %v212_v34  ;;  %v1115_v36 = vld [vmem:[%s1766_s4 + $0x20] sm:$0xff] }
 0x10f   :  { %1230 = vmatpush3.bf16.msra.mxu1 %v212_v34 }
 0x110   :  { %v213_v38 = vpack.c.bf16 %v1576_v35, %v1578_v37 }
 0x112   :  { %1231 = vmatprep.subr.bf16.mxu1 %v213_v38 }
 0x113   :  { %1232 = vmatpush3.bf16.msra.mxu1 %v213_v38  ;;  %v1116_v38 = vld [vmem:[%s1766_s4 + $0x28] sm:$0xff] }
 0x114   :  { %1350 = vmatprep.subr.bf16.mxu1 %v1349_v45  ;;  %v1357_v43 = vpack.c.bf16 %v1116_v38, %v1115_v36 }
 0x116   :  { %1234 = vmatmul.mubr.msk.bf16.vlgmr.msra.gmra.mrb[0].mxu1 %vm234_vm1, %v1582_v39 }
 0x117   :  { %1237 = vmatprep.mubr.msk.bf16.mxu1 %vm234_vm1, %v1584_v40  ;;  %1352 = vmatpush3.bf16.msra.mxu1 %v1349_v45  ;;  %v1361_v45 = vpack.c.bf16 %v1118_v44, %v1117_v42 }
 0x118   :  { %1354 = vmatprep.subr.bf16.mxu1 %v1353_v47 }
 0x11b   :  { %1356 = vmatpush3.bf16.msra.mxu1 %v1353_v47  ;;  %v474_v47 = vrot.slane %v320_v3, %v473_v46 }
 0x11c   :  { %1358 = vmatprep.subr.bf16.mxu1 %v1357_v43 }
 0x11e   :  { %1238 = vmatmul.mubr.msk.bf16.gmra.mrb[4].mxu1 %vm234_vm1, %v1590_v41 }
 0x1e9   :  { %v1235_v48 = vpop.f32.mrb[0].mxu1 }
 0x1ea   :  { %v281_v49 = vpop.f32.mrb[1].mxu1  ;;  %v314_v54 = vadd.f32 %v1235_v48, %v1566_v27  ;;  %v614_v48 = vsub.s32 2, %v1612_v1 }
 0x1eb   :  { %v312_v50 = vadd.f32 %v281_v49, %v1560_v22  ;;  %v1236_v51 = vpop.f32.mrb[2].mxu1  ;;  %v626_v49 = vsub.s32 3, %v1612_v1 }
 0x1ec   :  { %v284_v52 = vpop.f32.mrb[3].mxu1  ;;  %v315_v55 = vadd.f32 %v1236_v51, %v1564_v25 }
 0x1ed   :  { %v313_v53 = vadd.f32 %v284_v52, %v1558_v20  ;;  %1249 = vmatprep.mubr.msk.f32.mxu0 %vm329_vm2, %v312_v50  ;;  %v615_v52 = vrot.slane %v320_v3, %v614_v48 }
 0x1ef   :  { %1250 = vmatmul.mubr.msk.f32.vlgmr.msra.gmra.mrb[8].mxu0 %vm329_vm2, %v313_v53 }
 0x1f0   :  { %1252 = vmatprep.mubr.msk.f32.mxu0 %vm329_vm2, %v314_v54 }
 0x1f1   :  { %v1239_v56 = vpop.f32.mrb[4].mxu1 }
 0x1f2   :  { %v297_v57 = vpop.f32.mrb[5].mxu1  ;;  %v318_v62 = vadd.f32 %v1239_v56, %v1578_v37  ;;  %v627_v56 = vrot.slane %v320_v3, %v626_v49 }
 0x1f3   :  { %v316_v58 = vadd.f32 %v297_v57, %v1572_v32  ;;  %v1240_v59 = vpop.f32.mrb[6].mxu1  ;;  %1253 = vmatmul.mubr.msk.f32.gmra.mrb[10].mxu0 %vm329_vm2, %v315_v55 }
 0x1f4   :  { %v300_v60 = vpop.f32.mrb[7].mxu1  ;;  %v319_v63 = vadd.f32 %v1240_v59, %v1576_v35 }
 0x1f5   :  { %v317_v61 = vadd.f32 %v300_v60, %v1570_v30  ;;  %1255 = vmatprep.mubr.msk.f32.mxu0 %vm329_vm2, %v316_v58 }
 0x1f7   :  { %1256 = vmatmul.mubr.msk.f32.gmra.mrb[12].mxu0 %vm329_vm2, %v317_v61 }
 0x1f8   :  { %1258 = vmatprep.mubr.msk.f32.mxu0 %vm329_vm2, %v318_v62 }
 0x1fb   :  { %1259 = vmatmul.mubr.msk.f32.gmra.mrb[14].mxu0 %vm329_vm2, %v319_v63 }
 0x1fc   :  { %1289 = vmatprep.mubr.msk.bf16.mxu0 %vm234_vm1, %v1539_v11 }
 0x2c2   :  { %v1251_v5 = vpop.f32.mrb[8].mxu0 }
 0x2c3   :  { %v426_v6 = vadd.f32 %v1251_v5, %v328_v4  ;;  %v420_v7 = vpop.f32.mrb[9].mxu0 }
 0x2c4   :  { %v421_v8 = vadd.f32 %v420_v7, %v328_v4 }
 0x2c5   :  { %v460_v12 = vmax.f32 %v426_v6, 0.0 }
 0x2c6   :  { %v459_v9 = vmax.f32 %v421_v8, 0.0  ;;  %v1254_v10 = vpop.f32.mrb[10].mxu0 }
 0x2c7   :  { %v436_v11 = vadd.f32 %v1254_v10, %v328_v4  ;;  %v430_v13 = vpop.f32.mrb[11].mxu0 }
 0x2c8   :  { %v431_v14 = vadd.f32 %v430_v13, %v328_v4  ;;  %1269 = vmatprep.mubr.msk.f32.mxu1 %vm329_vm2, %v459_v9 }
 0x2c9   :  { %1270 = vmatmul.mubr.msk.f32.vlgmr.msra.gmra.mrb[8].mxu1 %vm329_vm2, %v460_v12  ;;  %v462_v17 = vmax.f32 %v436_v11, 0.0 }
 0x2ca   :  { %v461_v15 = vmax.f32 %v431_v14, 0.0  ;;  %v1257_v16 = vpop.f32.mrb[12].mxu0  ;;  %1360 = vmatpush3.bf16.msra.mxu1 %v1357_v43 }
 0x2cb   :  { %v446_v18 = vadd.f32 %v1257_v16, %v328_v4  ;;  %v440_v19 = vpop.f32.mrb[13].mxu0  ;;  %1362 = vmatprep.subr.bf16.mxu1 %v1361_v45 }
 0x2cc   :  { %v441_v21 = vadd.f32 %v440_v19, %v328_v4  ;;  %1272 = vmatprep.mubr.msk.f32.mxu1 %vm329_vm2, %v461_v15 }
 0x2cd   :  { %1273 = vmatmul.mubr.msk.f32.gmra.mrb[10].mxu1 %vm329_vm2, %v462_v17  ;;  %v464_v26 = vmax.f32 %v446_v18, 0.0 }
 0x2ce   :  { %v463_v23 = vmax.f32 %v441_v21, 0.0  ;;  %v1260_v24 = vpop.f32.mrb[14].mxu0  ;;  %1364 = vmatpush3.bf16.msra.mxu1 %v1361_v45 }
 0x2cf   :  { %v456_v28 = vadd.f32 %v1260_v24, %v328_v4  ;;  %v450_v29 = vpop.f32.mrb[15].mxu0 }
 0x2d0   :  { %v451_v31 = vadd.f32 %v450_v29, %v328_v4  ;;  %1275 = vmatprep.mubr.msk.f32.mxu1 %vm329_vm2, %v463_v23 }
 0x2d1   :  { %1276 = vmatmul.mubr.msk.f32.gmra.mrb[12].mxu1 %vm329_vm2, %v464_v26  ;;  %v466_v34 = vmax.f32 %v456_v28, 0.0 }
 0x2d2   :  { %v465_v33 = vmax.f32 %v451_v31, 0.0 }
 0x2d4   :  { %1278 = vmatprep.mubr.msk.f32.mxu1 %vm329_vm2, %v465_v33 }
 0x2d5   :  { %1279 = vmatmul.mubr.msk.f32.gmra.mrb[14].mxu1 %vm329_vm2, %v466_v34 }
 0x39c   :  { %v1271_v50 = vpop.f32.mrb[8].mxu1 }
 0x39d   :  { %v571_v51 = vadd.f32 %v1271_v50, %v474_v47  ;;  %v565_v53 = vpop.f32.mrb[9].mxu1 }
 0x39e   :  { %v566_v54 = vadd.f32 %v565_v53, %v474_v47 }
 0x39f   :  { %v605_v55 = vmax.f32 %v571_v51, 0.0 }
 0x3a0   :  { %v604_v57 = vmax.f32 %v566_v54, 0.0  ;;  %v1274_v58 = vpop.f32.mrb[10].mxu1 }
 0x3a1   :  { %v617_v59 = vmul.f32 %v615_v52, %v605_v55  ;;  %v581_v60 = vadd.f32 %v1274_v58, %v474_v47  ;;  %v575_v61 = vpop.f32.mrb[11].mxu1 }
 0x3a2   :  { %v616_v62 = vmul.f32 %v615_v52, %v604_v57  ;;  %v576_v63 = vadd.f32 %v575_v61, %v474_v47 }
 0x3a3   :  { %v629_v0 = vadd.f32 %v627_v56, %v617_v59  ;;  %v607_v4 = vmax.f32 %v581_v60, 0.0  ;;  %v881_v60 = vld [vmem:[#allocation4 + $0x38] sm:$0xff] }
 0x3a4   :  { %v628_v5 = vadd.f32 %v627_v56, %v616_v62  ;;  %v606_v6 = vmax.f32 %v576_v63, 0.0  ;;  %v1277_v7 = vpop.f32.mrb[12].mxu1 }
 0x3a5   :  { %v637_v8 = vmax.f32 %v629_v0, 0.0  ;;  %v619_v9 = vmul.f32 %v615_v52, %v607_v4  ;;  %v591_v10 = vadd.f32 %v1277_v7, %v474_v47  ;;  %v585_v12 = vpop.f32.mrb[13].mxu1 }
 0x3a6   :  { %v636_v11 = vmax.f32 %v628_v5, 0.0  ;;  %v618_v13 = vmul.f32 %v615_v52, %v606_v6  ;;  %v586_v14 = vadd.f32 %v585_v12, %v474_v47 }
 0x3a7   :  { %v1650_v3 = vadd.f32 %v637_v8, %v1558_v20  ;;  %v631_v15 = vadd.f32 %v627_v56, %v619_v9  ;;  %v609_v16 = vmax.f32 %v591_v10, 0.0 }
 0x3a8   :  { %v1653_v17 = vadd.f32 %v636_v11, %v1560_v22  ;;  %v630_v18 = vadd.f32 %v627_v56, %v618_v13  ;;  %v608_v19 = vmax.f32 %v586_v14, 0.0  ;;  %v1280_v21 = vpop.f32.mrb[14].mxu1  ;;  %v1114_v14 = vld [vmem:[%s1768_s6 + $0x4] sm:$0xf] }
 0x3a9   :  { %v639_v23 = vmax.f32 %v631_v15, 0.0  ;;  %v621_v24 = vmul.f32 %v615_v52, %v609_v16  ;;  %v601_v26 = vadd.f32 %v1280_v21, %v474_v47  ;;  %v595_v28 = vpop.f32.mrb[15].mxu1  ;;  %v739_v15 = vrot.slane %v1114_v14, %v327_v2 }
 0x3aa   :  { %v638_v29 = vmax.f32 %v630_v18, 0.0  ;;  %v620_v31 = vmul.f32 %v615_v52, %v608_v19  ;;  %v596_v33 = vadd.f32 %v595_v28, %v474_v47  ;;  %v652_v34 = vpack.c.bf16 %v1650_v3, %v1653_v17 }
 0x3ab   :  { %v1658_v20 = vadd.f32 %v639_v23, %v1564_v25  ;;  %v633_v36 = vadd.f32 %v627_v56, %v621_v24  ;;  %v611_v38 = vmax.f32 %v601_v26, 0.0 }
 0x3ac   :  { %v1661_v22 = vadd.f32 %v638_v29, %v1566_v27  ;;  %v632_v42 = vadd.f32 %v627_v56, %v620_v31  ;;  %v610_v43 = vmax.f32 %v596_v33, 0.0  ;;  %1281 = vmatprep.subr.bf16.mxu0 %v652_v34 }
 0x3ad   :  { %v641_v44 = vmax.f32 %v633_v36, 0.0  ;;  %v623_v45 = vmul.f32 %v615_v52, %v611_v38  ;;  %1282 = vmatpush3.bf16.msra.mxu0 %v652_v34 }
 0x3ae   :  { %v640_v50 = vmax.f32 %v632_v42, 0.0  ;;  %v622_v51 = vmul.f32 %v615_v52, %v610_v43  ;;  %v653_v47 = vpack.c.bf16 %v1658_v20, %v1661_v22 }
 0x3af   :  { %v1666_v53 = vadd.f32 %v641_v44, %v1570_v30  ;;  %v635_v25 = vadd.f32 %v627_v56, %v623_v45 }
 0x3b0   :  { %v1669_v54 = vadd.f32 %v640_v50, %v1572_v32  ;;  %v634_v27 = vadd.f32 %v627_v56, %v622_v51  ;;  %1283 = vmatprep.subr.bf16.mxu0 %v653_v47  ;;  %v878_v32 = vld [vmem:[#allocation4 + $0x20] sm:$0xff] }
 0x3b1   :  { %v643_v55 = vmax.f32 %v635_v25, 0.0  ;;  %1284 = vmatpush3.bf16.msra.mxu0 %v653_v47 }
 0x3b2   :  { %v642_v57 = vmax.f32 %v634_v27, 0.0  ;;  %v654_v58 = vpack.c.bf16 %v1666_v53, %v1669_v54 }
 0x3b3   :  { %v1674_v52 = vadd.f32 %v643_v55, %v1576_v35  ;;  %v879_v35 = vld [vmem:[#allocation4 + $0x28] sm:$0xff]  ;;  %v885_v55 = vrot.slane %v1114_v14, %v473_v46 }
 0x3b4   :  { %v1677_v59 = vadd.f32 %v642_v57, %v1578_v37  ;;  %1285 = vmatprep.subr.bf16.mxu0 %v654_v58  ;;  %v880_v37 = vld [vmem:[#allocation4 + $0x30] sm:$0xff]  ;;  %v1365_v56 = vpack.c.bf16 %v879_v35, %v878_v32 }
 0x3b5   :  { %1286 = vmatpush3.bf16.msra.mxu0 %v654_v58  ;;  %v1369_v61 = vpack.c.bf16 %v881_v60, %v880_v37 }
 0x3b6   :  { %v655_v30 = vpack.c.bf16 %v1674_v52, %v1677_v59 }
 0x3b8   :  { %1287 = vmatprep.subr.bf16.mxu0 %v655_v30 }
 0x3b9   :  { %1288 = vmatpush3.bf16.msra.mxu0 %v655_v30  ;;  %v1026_v30 = vrot.slane %v1114_v14, %v614_v48 }
 0x3ba   :  { %1366 = vmatprep.subr.bf16.mxu0 %v1365_v56 }
 0x3bc   :  { %1290 = vmatmul.mubr.msk.bf16.vlgmr.msra.gmra.mrb[16].mxu0 %vm234_vm1, %v1582_v39 }
 0x3bd   :  { %1293 = vmatprep.mubr.msk.bf16.mxu0 %vm234_vm1, %v1584_v40  ;;  %1368 = vmatpush3.bf16.msra.mxu0 %v1365_v56  ;;  %v1038_v56 = vrot.slane %v1114_v14, %v626_v49 }
 0x3be   :  { %1370 = vmatprep.subr.bf16.mxu0 %v1369_v61 }
 0x3c1   :  { %1372 = vmatpush3.bf16.msra.mxu0 %v1369_v61 }
 0x3c4   :  { %1294 = vmatmul.mubr.msk.bf16.gmra.mrb[20].mxu0 %vm234_vm1, %v1590_v41 }
 0x48f   :  { %v1291_v62 = vpop.f32.mrb[16].mxu0 }
 0x490   :  { %v690_v63 = vpop.f32.mrb[17].mxu0  ;;  %v723_v41 = vadd.f32 %v1291_v62, %v1661_v22 }
 0x491   :  { %v721_v39 = vadd.f32 %v690_v63, %v1653_v17  ;;  %v1292_v0 = vpop.f32.mrb[18].mxu0 }
 0x492   :  { %v693_v4 = vpop.f32.mrb[19].mxu0  ;;  %v724_v5 = vadd.f32 %v1292_v0, %v1658_v20 }
 0x493   :  { %v722_v40 = vadd.f32 %v693_v4, %v1650_v3  ;;  %1305 = vmatprep.mubr.msk.f32.mxu1 %vm329_vm2, %v721_v39 }
 0x495   :  { %1306 = vmatmul.mubr.msk.f32.vlgmr.msra.gmra.mrb[16].mxu1 %vm329_vm2, %v722_v40 }
 0x496   :  { %1308 = vmatprep.mubr.msk.f32.mxu1 %vm329_vm2, %v723_v41 }
 0x497   :  { %v1295_v6 = vpop.f32.mrb[20].mxu0 }
 0x498   :  { %v706_v7 = vpop.f32.mrb[21].mxu0  ;;  %v727_v11 = vadd.f32 %v1295_v6, %v1677_v59 }
 0x499   :  { %v725_v8 = vadd.f32 %v706_v7, %v1669_v54  ;;  %v1296_v9 = vpop.f32.mrb[22].mxu0  ;;  %1309 = vmatmul.mubr.msk.f32.gmra.mrb[18].mxu1 %vm329_vm2, %v724_v5 }
 0x49a   :  { %v709_v10 = vpop.f32.mrb[23].mxu0  ;;  %v728_v13 = vadd.f32 %v1296_v9, %v1674_v52 }
 0x49b   :  { %v726_v12 = vadd.f32 %v709_v10, %v1666_v53  ;;  %1311 = vmatprep.mubr.msk.f32.mxu1 %vm329_vm2, %v725_v8 }
 0x49d   :  { %1312 = vmatmul.mubr.msk.f32.gmra.mrb[20].mxu1 %vm329_vm2, %v726_v12 }
 0x49e   :  { %1314 = vmatprep.mubr.msk.f32.mxu1 %vm329_vm2, %v727_v11 }
 0x4a1   :  { %1315 = vmatmul.mubr.msk.f32.gmra.mrb[22].mxu1 %vm329_vm2, %v728_v13 }
 0x568   :  { %v1307_v16 = vpop.f32.mrb[16].mxu1 }
 0x569   :  { %v836_v18 = vadd.f32 %v1307_v16, %v739_v15  ;;  %v830_v19 = vpop.f32.mrb[17].mxu1 }
 0x56a   :  { %v831_v21 = vadd.f32 %v830_v19, %v739_v15 }
 0x56b   :  { %v870_v26 = vmax.f32 %v836_v18, 0.0 }
 0x56c   :  { %v869_v23 = vmax.f32 %v831_v21, 0.0  ;;  %v1310_v24 = vpop.f32.mrb[18].mxu1 }
 0x56d   :  { %v846_v28 = vadd.f32 %v1310_v24, %v739_v15  ;;  %v840_v29 = vpop.f32.mrb[19].mxu1 }
 0x56e   :  { %v841_v31 = vadd.f32 %v840_v29, %v739_v15  ;;  %1325 = vmatprep.mubr.msk.f32.mxu0 %vm329_vm2, %v869_v23 }
 0x56f   :  { %1326 = vmatmul.mubr.msk.f32.vlgmr.msra.gmra.mrb[24].mxu0 %vm329_vm2, %v870_v26  ;;  %v872_v36 = vmax.f32 %v846_v28, 0.0 }
 0x570   :  { %v871_v33 = vmax.f32 %v841_v31, 0.0  ;;  %v1313_v34 = vpop.f32.mrb[20].mxu1 }
 0x571   :  { %v856_v38 = vadd.f32 %v1313_v34, %v739_v15  ;;  %v850_v42 = vpop.f32.mrb[21].mxu1 }
 0x572   :  { %v851_v2 = vadd.f32 %v850_v42, %v739_v15  ;;  %1328 = vmatprep.mubr.msk.f32.mxu0 %vm329_vm2, %v871_v33 }
 0x573   :  { %1329 = vmatmul.mubr.msk.f32.gmra.mrb[26].mxu0 %vm329_vm2, %v872_v36  ;;  %v874_v45 = vmax.f32 %v856_v38, 0.0 }
 0x574   :  { %v873_v43 = vmax.f32 %v851_v2, 0.0  ;;  %v1316_v44 = vpop.f32.mrb[22].mxu1 }
 0x575   :  { %v866_v50 = vadd.f32 %v1316_v44, %v739_v15  ;;  %v860_v51 = vpop.f32.mrb[23].mxu1 }
 0x576   :  { %v861_v47 = vadd.f32 %v860_v51, %v739_v15  ;;  %1331 = vmatprep.mubr.msk.f32.mxu0 %vm329_vm2, %v873_v43 }
 0x577   :  { %1332 = vmatmul.mubr.msk.f32.gmra.mrb[28].mxu0 %vm329_vm2, %v874_v45  ;;  %v876_v27 = vmax.f32 %v866_v50, 0.0 }
 0x578   :  { %v875_v25 = vmax.f32 %v861_v47, 0.0 }
 0x57a   :  { %1334 = vmatprep.mubr.msk.f32.mxu0 %vm329_vm2, %v875_v25 }
 0x57b   :  { %1335 = vmatmul.mubr.msk.f32.gmra.mrb[30].mxu0 %vm329_vm2, %v876_v27 }
 0x642   :  { %v1327_v57 = vpop.f32.mrb[24].mxu0 }
 0x643   :  { %v982_v58 = vadd.f32 %v1327_v57, %v885_v55  ;;  %v976_v32 = vpop.f32.mrb[25].mxu0 }
 0x644   :  { %v977_v35 = vadd.f32 %v976_v32, %v885_v55 }
 0x645   :  { %v1016_v37 = vmax.f32 %v982_v58, 0.0 }
 0x646   :  { %v1015_v60 = vmax.f32 %v977_v35, 0.0  ;;  %v1330_v61 = vpop.f32.mrb[26].mxu0 }
 0x647   :  { %v1028_v62 = vmul.f32 %v1026_v30, %v1016_v37  ;;  %v992_v63 = vadd.f32 %v1330_v61, %v885_v55  ;;  %v986_v39 = vpop.f32.mrb[27].mxu0 }
 0x648   :  { %v1027_v0 = vmul.f32 %v1026_v30, %v1015_v60  ;;  %v987_v4 = vadd.f32 %v986_v39, %v885_v55 }
 0x649   :  { %v1040_v40 = vadd.f32 %v1038_v56, %v1028_v62  ;;  %v1018_v46 = vmax.f32 %v992_v63, 0.0 }
 0x64a   :  { %v1039_v41 = vadd.f32 %v1038_v56, %v1027_v0  ;;  %v1017_v5 = vmax.f32 %v987_v4, 0.0  ;;  %v1333_v6 = vpop.f32.mrb[28].mxu0 }
 0x64b   :  { %v1048_v7 = vmax.f32 %v1040_v40, 0.0  ;;  %v1030_v48 = vmul.f32 %v1026_v30, %v1018_v46  ;;  %v1002_v8 = vadd.f32 %v1333_v6, %v885_v55  ;;  %v996_v9 = vpop.f32.mrb[29].mxu0 }
 0x64c   :  { %v1047_v10 = vmax.f32 %v1039_v41, 0.0  ;;  %v1029_v12 = vmul.f32 %v1026_v30, %v1017_v5  ;;  %v997_v1 = vadd.f32 %v996_v9, %v885_v55 }
 0x64d   :  { %v1056_v49 = vadd.f32 %v1048_v7, %v1650_v3  ;;  %v1042_v11 = vadd.f32 %v1038_v56, %v1030_v48  ;;  %v1020_v13 = vmax.f32 %v1002_v8, 0.0 }
 0x64e   :  { %v1055_v14 = vadd.f32 %v1047_v10, %v1653_v17  ;;  %v1041_v15 = vadd.f32 %v1038_v56, %v1029_v12  ;;  %v1019_v16 = vmax.f32 %v997_v1, 0.0  ;;  %v1336_v18 = vpop.f32.mrb[30].mxu0 }
 0x64f   :  { %1064 = vst.msk [vmem:[%s1769_s7 + $0x8] sm:$0xff] %vm329_vm2, %v1056_v49  ;;  %v1050_v19 = vmax.f32 %v1042_v11, 0.0  ;;  %v1032_v21 = vmul.f32 %v1026_v30, %v1020_v13  ;;  %v1012_v23 = vadd.f32 %v1336_v18, %v885_v55  ;;  %v1006_v24 = vpop.f32.mrb[31].mxu0 }
 0x650   :  { %1063 = vst.msk [vmem:[%s1769_s7] sm:$0xff] %vm329_vm2, %v1055_v14  ;;  %v1049_v3 = vmax.f32 %v1041_v15, 0.0  ;;  %v1031_v26 = vmul.f32 %v1026_v30, %v1019_v16  ;;  %v1007_v17 = vadd.f32 %v1006_v24, %v885_v55 }
 0x651   :  { %v1058_v28 = vadd.f32 %v1050_v19, %v1658_v20  ;;  %v1044_v29 = vadd.f32 %v1038_v56, %v1032_v21  ;;  %v1022_v31 = vmax.f32 %v1012_v23, 0.0 }
 0x652   :  { %v1057_v33 = vadd.f32 %v1049_v3, %v1661_v22  ;;  %v1043_v34 = vadd.f32 %v1038_v56, %v1031_v26  ;;  %v1021_v36 = vmax.f32 %v1007_v17, 0.0 }
 0x653   :  { %1066 = vst.msk [vmem:[%s1769_s7 + $0x18] sm:$0xff] %vm329_vm2, %v1058_v28  ;;  %v1052_v38 = vmax.f32 %v1044_v29, 0.0  ;;  %v1034_v42 = vmul.f32 %v1026_v30, %v1022_v31 }
 0x654   :  { %1065 = vst.msk [vmem:[%s1769_s7 + $0x10] sm:$0xff] %vm329_vm2, %v1057_v33  ;;  %v1051_v2 = vmax.f32 %v1043_v34, 0.0  ;;  %v1033_v20 = vmul.f32 %v1026_v30, %v1021_v36 }
 0x655   :  { %v1060_v43 = vadd.f32 %v1052_v38, %v1666_v53  ;;  %v1046_v44 = vadd.f32 %v1038_v56, %v1034_v42 }
 0x656   :  { %v1059_v22 = vadd.f32 %v1051_v2, %v1669_v54  ;;  %v1045_v45 = vadd.f32 %v1038_v56, %v1033_v20 }
 0x657   :  { %1068 = vst.msk [vmem:[%s1769_s7 + $0x28] sm:$0xff] %vm329_vm2, %v1060_v43  ;;  %v1054_v50 = vmax.f32 %v1046_v44, 0.0 }
 0x658   :  { %1067 = vst.msk [vmem:[%s1769_s7 + $0x20] sm:$0xff] %vm329_vm2, %v1059_v22  ;;  %v1053_v51 = vmax.f32 %v1045_v45, 0.0 }
 0x659   :  { %v1062_v47 = vadd.f32 %v1054_v50, %v1674_v52 }
 0x65a   :  { %v1061_v53 = vadd.f32 %v1053_v51, %v1677_v59 }
 0x65b   :  { %1070 = vst.msk [vmem:[%s1769_s7 + $0x38] sm:$0xff] %vm329_vm2, %v1062_v47 }
 0x65c   :  { %1069 = vst.msk [vmem:[%s1769_s7 + $0x30] sm:$0xff] %vm329_vm2, %v1061_v53 }
 0x65d   :  { %1075 = vsyncpa [#allocation3], 1 }
 0x65e   :  { %1076 = vsyncpa [#allocation5], 1 }

</bundles_post_ra>
